<compile_context>
chip_gen: v6e
topology: v6e:2x2x1
jax: 0.10.0
libtpu: 0.0.40
codegen_flags: <defaults>
</compile_context>

<pallas_src>
import functools

import jax
import jax.numpy as jnp
from jax.experimental import pallas as pl
from jax.experimental.pallas import tpu as pltpu

LN_EPS = 1e-12  # DistilBERT LayerNorm eps


def _layernorm(x, gamma, beta):
    mean = jnp.mean(x, axis=-1, keepdims=True)
    var = jnp.mean((x - mean) ** 2, axis=-1, keepdims=True)
    return (x - mean) * jax.lax.rsqrt(var + LN_EPS) * gamma + beta


def _gelu(x):
    # TODO(synk): HF DistilBERT uses exact erf-GELU; tanh approximation used
    # here (EUP-friendly on TPU, numerically very close).
    return 0.5 * x * (1.0 + jnp.tanh(0.7978845608028654 * (x + 0.044715 * x * x * x)))


# ---------------------------------------------------------------------------
# Embedding kernel: (word_emb + pos_emb) -> LayerNorm, bf16 out (fused add+LN)
# ---------------------------------------------------------------------------
def embed_ln_kernel(word_ref, pos_ref, g_ref, b_ref, out_ref):
    x = word_ref[0].astype(jnp.float32) + pos_ref[...].astype(jnp.float32)   # (S, H)
    out_ref[0] = _layernorm(x, g_ref[...], b_ref[...]).astype(out_ref.dtype)


def embed_layernorm(word, pos, gamma, beta):
    B, S, H = word.shape
    return pl.pallas_call(
        embed_ln_kernel,
        out_shape=jax.ShapeDtypeStruct((B, S, H), jnp.bfloat16),
        grid=(B,),
        in_specs=[
            pl.BlockSpec((1, S, H), lambda b: (b, 0, 0)),
            pl.BlockSpec((S, H), lambda b: (0, 0)),
            pl.BlockSpec((1, H), lambda b: (0, 0)),
            pl.BlockSpec((1, H), lambda b: (0, 0)),
        ],
        out_specs=pl.BlockSpec((1, S, H), lambda b: (b, 0, 0)),
        compiler_params=pltpu.CompilerParams(dimension_semantics=("parallel",)),
    )(word, pos, gamma, beta)


# ---------------------------------------------------------------------------
# Layer-stacked transformer kernel (MHSA + FFN, post-LN)
# grid = (batch, layer, q-tile); hidden state lives in VMEM scratch.
# ---------------------------------------------------------------------------
def stacked_layers_kernel(x_ref, mask_ref,
                          wq_ref, bq_ref, wk_ref, bk_ref, wv_ref, bv_ref,
                          wo_ref, bo_ref, ln1g_ref, ln1b_ref,
                          w1_ref, b1_ref, w2_ref, b2_ref,
                          ln2g_ref, ln2b_ref,
                          out_ref,
                          hbuf, kbuf, vbuf,
                          *, n_heads, q_tile):
    _, S, H = x_ref.shape
    TQ = q_tile
    hd = H // n_heads
    bf16 = jnp.bfloat16
    scale = jnp.float32(1.0 / (hd ** 0.5))

    l = pl.program_id(1)
    qi = pl.program_id(2)
    row0 = pl.multiple_of(qi * TQ, TQ)

    # Load this batch element's embedding output into the resident hidden
    # buffer at the first (layer, q-tile) step of the batch.
    @pl.when(jnp.logical_and(l == 0, qi == 0))
    def _():
        hbuf[...] = x_ref[0]

    # K / V projections: computed once per layer (q-invariant), stored
    # head-major (nh, S, hd) in VMEM scratch so query tiles reuse them.
    @pl.when(qi == 0)
    def _():
        x_full = hbuf[...]                                            # (S, H) bf16
        k = jnp.dot(x_full, wk_ref[0], preferred_element_type=jnp.float32) + bk_ref[0]
        v = jnp.dot(x_full, wv_ref[0], preferred_element_type=jnp.float32) + bv_ref[0]
        kbuf[...] = jnp.transpose(k.astype(bf16).reshape(S, n_heads, hd), (1, 0, 2))
        vbuf[...] = jnp.transpose(v.astype(bf16).reshape(S, n_heads, hd), (1, 0, 2))

    # NOTE: residual stream is carried in bf16 (f32 in the PyTorch reference);
    # acceptable rounding for inference.
    x_q = hbuf[pl.ds(row0, TQ), :]                                    # (TQ, H) bf16
    x_q32 = x_q.astype(jnp.float32)

    # Q projection for this tile (bf16 MXU, f32 accumulate).
    q = jnp.dot(x_q, wq_ref[0], preferred_element_type=jnp.float32) + bq_ref[0]
    q = q * scale
    qh = jnp.transpose(q.astype(bf16).reshape(TQ, n_heads, hd), (1, 0, 2))  # (nh,TQ,hd)

    kh = kbuf[...]                                                    # (nh, S, hd)
    vh = vbuf[...]

    # Head-batched attention scores + additive mask (no compare/select).
    scores = jnp.einsum("hqd,hkd->hqk", qh, kh,
                        preferred_element_type=jnp.float32)           # (nh, TQ, S)
    add_mask = (mask_ref[0] - 1.0) * jnp.float32(1e9)                 # (1, S): 0 keep, -1e9 pad
    scores = scores + add_mask[None, :, :]
    scores = scores - jnp.max(scores, axis=-1, keepdims=True)
    p = jnp.exp(scores)
    p = p * pl.reciprocal(jnp.sum(p, axis=-1, keepdims=True), approx=True)

    ctx = jnp.einsum("hqk,hkd->hqd", p.astype(bf16), vh,
                     preferred_element_type=jnp.float32)              # (nh, TQ, hd)

    # Output projection: flatten heads once, single full-depth matmul.
    ctx_flat = jnp.transpose(ctx.astype(bf16), (1, 0, 2)).reshape(TQ, H)
    attn = jnp.dot(ctx_flat, wo_ref[0], preferred_element_type=jnp.float32) + bo_ref[0]

    x1 = _layernorm(x_q32 + attn, ln1g_ref[0], ln1b_ref[0])           # f32 (TQ, H)

    # FFN
    hmid = jnp.dot(x1.astype(bf16), w1_ref[0],
                   preferred_element_type=jnp.float32) + b1_ref[0]
    hmid = _gelu(hmid)
    ffn = jnp.dot(hmid.astype(bf16), w2_ref[0],
                  preferred_element_type=jnp.float32) + b2_ref[0]
    x2 = _layernorm(x1 + ffn, ln2g_ref[0], ln2b_ref[0])

    out_tile = x2.astype(bf16)
    hbuf[pl.ds(row0, TQ), :] = out_tile     # carried hidden state for next layer
    out_ref[0] = out_tile                   # last layer's write is the final value


def _vmem_budget_bytes():
    try:
        cap = int(pltpu.get_tpu_info().vmem_capacity_bytes)
    except Exception:
        cap = 64 * 1024 * 1024              # conservative (v7x per-TensorCore)
    return (cap * 3) // 4                    # headroom for compiler-internal scratch


def _choose_q_tile(S, H, F, n_heads, budget_bytes):
    """Largest query tile (divisor of S, multiple of 8 unless == S) that fits."""
    hd = H // n_heads

    def fits(tq):
        bf, f4 = 2, 4
        weights = 2 * (4 * H * H + 2 * H * F) * bf            # double-buffered layer weights
        scratch = (S * H + 2 * n_heads * S * hd) * bf         # hidden + K/V scratch
        io = 2 * (S * H + tq * H) * bf + 4 * S * f4           # x in, out tile, mask
        interm = (2 * n_heads * tq * S + tq * F + 6 * tq * H) * f4
        return weights + scratch + io + interm + (4 << 20) <= budget_bytes

    cands = [S] + [t for t in (1024, 512, 256, 128, 64, 32, 16, 8)
                   if t < S and S % t == 0]
    for t in cands:
        if fits(t):
            return t
    return cands[-1]


def transformer_stack(x, mask3, lw, n_heads):
    """Run all transformer layers in one pallas_call. lw: dict of (L, ...) arrays."""
    B, S, H = x.shape
    L = lw["wq"].shape[0]
    F = lw["w1"].shape[2]
    hd = H // n_heads

    budget = _vmem_budget_bytes()
    TQ = _choose_q_tile(S, H, F, n_heads, budget)
    n_qt = S // TQ

    def wmap(b, l, q):          # layer-indexed weight blocks (prefetched for l+1)
        return (l, 0, 0)

    in_specs = [
        pl.BlockSpec((1, S, H), lambda b, l, q: (b, 0, 0)),   # embedding output
        pl.BlockSpec((1, 1, S), lambda b, l, q: (b, 0, 0)),   # attention mask
        pl.BlockSpec((1, H, H), wmap), pl.BlockSpec((1, 1, H), wmap),   # wq, bq
        pl.BlockSpec((1, H, H), wmap), pl.BlockSpec((1, 1, H), wmap),   # wk, bk
        pl.BlockSpec((1, H, H), wmap), pl.BlockSpec((1, 1, H), wmap),   # wv, bv
        pl.BlockSpec((1, H, H), wmap), pl.BlockSpec((1, 1, H), wmap),   # wo, bo
        pl.BlockSpec((1, 1, H), wmap), pl.BlockSpec((1, 1, H), wmap),   # sa_layer_norm
        pl.BlockSpec((1, H, F), wmap), pl.BlockSpec((1, 1, F), wmap),   # ffn lin1
        pl.BlockSpec((1, F, H), wmap), pl.BlockSpec((1, 1, H), wmap),   # ffn lin2
        pl.BlockSpec((1, 1, H), wmap), pl.BlockSpec((1, 1, H), wmap),   # output_layer_norm
    ]
    return pl.pallas_call(
        functools.partial(stacked_layers_kernel, n_heads=n_heads, q_tile=TQ),
        out_shape=jax.ShapeDtypeStruct((B, S, H), jnp.bfloat16),
        grid=(B, L, n_qt),
        in_specs=in_specs,
        out_specs=pl.BlockSpec((1, TQ, H), lambda b, l, q: (b, q, 0)),
        scratch_shapes=[
            pltpu.VMEM((S, H), jnp.bfloat16),                 # resident hidden state
            pltpu.VMEM((n_heads, S, hd), jnp.bfloat16),       # K (head-major)
            pltpu.VMEM((n_heads, S, hd), jnp.bfloat16),       # V (head-major)
        ],
        compiler_params=pltpu.CompilerParams(
            dimension_semantics=("parallel", "arbitrary", "arbitrary"),
            vmem_limit_bytes=int(budget)),
    )(x, mask3,
      lw["wq"], lw["bq"], lw["wk"], lw["bk"], lw["wv"], lw["bv"],
      lw["wo"], lw["bo"], lw["ln1_g"], lw["ln1_b"],
      lw["w1"], lw["b1"], lw["w2"], lw["b2"], lw["ln2_g"], lw["ln2_b"])


# ---------------------------------------------------------------------------
# Classifier head: logits = pooled @ Wc + bc (weights pre-padded to 128 lanes)
# ---------------------------------------------------------------------------
def classifier_kernel(x_ref, w_ref, b_ref, out_ref):
    out_ref[...] = (jnp.dot(x_ref[...], w_ref[...],
                            preferred_element_type=jnp.float32)
                    + b_ref[...]).astype(out_ref.dtype)


def classifier(x, w, b):
    B, H = x.shape
    N = w.shape[1]
    return pl.pallas_call(
        classifier_kernel,
        out_shape=jax.ShapeDtypeStruct((B, N), jnp.float32),
        grid=(1,),
        in_specs=[
            pl.BlockSpec((B, H), lambda i: (0, 0)),
            pl.BlockSpec((H, N), lambda i: (0, 0)),
            pl.BlockSpec((1, N), lambda i: (0, 0)),
        ],
        out_specs=pl.BlockSpec((B, N), lambda i: (0, 0)),
    )(x, w, b)


# ---------------------------------------------------------------------------
# Full forward pass (glue + kernels)
# ---------------------------------------------------------------------------
def distilbert_file_classifier_forward(params, input_ids, attention_mask):
    B, S = input_ids.shape
    # TODO(synk): vocab gather stays in plain JAX (no clean Pallas equivalent);
    # tables are bf16 and the add+LayerNorm is fused into the Pallas kernel.
    word = params["word_emb"][input_ids]                      # (B, S, H) bf16
    pos = params["pos_emb"][:S]                               # (S, H)    bf16
    h = embed_layernorm(word, pos, params["emb_ln_g"], params["emb_ln_b"])

    mask3 = attention_mask.astype(jnp.float32)[:, None, :]    # (B, 1, S)
    h = transformer_stack(h, mask3, params["layers"], params["n_heads"])

    pooled = h[:, 0].astype(jnp.float32)                      # CLS token (B, H)
    logits = classifier(pooled, params["cls_w_pad"], params["cls_b_pad"])[:, :1]
    return logits                                             # (B, 1) f32


# ---------------------------------------------------------------------------
# Deterministic synthetic parameter init (shapes mirror DistilBERT config);
# layer weights are stacked along a leading L axis for the layer-grid kernel.
# ---------------------------------------------------------------------------
def init_params(key, *, vocab_size, max_pos, H, F, n_heads, n_layers):
    ks = iter(jax.random.split(key, 16 + 6 * n_layers))
    bf16, f32 = jnp.bfloat16, jnp.float32

    def w(shape, dtype, scale=0.02):
        return (scale * jax.random.normal(next(ks), shape)).astype(dtype)

    def stacked(shape, dtype):
        return jnp.stack([w(shape, dtype) for _ in range(n_layers)], axis=0)

    cls_w = w((H, 1), f32)
    cls_w_pad = jnp.zeros((H, 128), f32).at[:, :1].set(cls_w)   # built once at init
    cls_b_pad = jnp.zeros((1, 128), f32)

    params = {
        "n_heads": n_heads,
        "word_emb": w((vocab_size, H), bf16),
        "pos_emb": w((max_pos, H), bf16),
        "emb_ln_g": jnp.ones((1, H), f32),
        "emb_ln_b": jnp.zeros((1, H), f32),
        "cls_w_pad": cls_w_pad,
        "cls_b_pad": cls_b_pad,
        "layers": {
            "wq": stacked((H, H), bf16), "bq": jnp.zeros((n_layers, 1, H), f32),
            "wk": stacked((H, H), bf16), "bk": jnp.zeros((n_layers, 1, H), f32),
            "wv": stacked((H, H), bf16), "bv": jnp.zeros((n_layers, 1, H), f32),
            "wo": stacked((H, H), bf16), "bo": jnp.zeros((n_layers, 1, H), f32),
            "ln1_g": jnp.ones((n_layers, 1, H), f32),
            "ln1_b": jnp.zeros((n_layers, 1, H), f32),
            "w1": stacked((H, F), bf16), "b1": jnp.zeros((n_layers, 1, F), f32),
            "w2": stacked((F, H), bf16), "b2": jnp.zeros((n_layers, 1, H), f32),
            "ln2_g": jnp.ones((n_layers, 1, H), f32),
            "ln2_b": jnp.zeros((n_layers, 1, H), f32),
        },
    }
    return params


if __name__ == "__main__":
    # Small DistilBERT-like config: B=2, S=16, H=64, 4 heads, FFN=128, 2 layers.
    B, S, H, F, n_heads, n_layers = 2, 16, 64, 128, 4, 2
    vocab_size, max_pos = 50, 32

    key = jax.random.PRNGKey(0)
    pkey, ikey = jax.random.split(key)
    params = init_params(pkey, vocab_size=vocab_size, max_pos=max_pos,
                         H=H, F=F, n_heads=n_heads, n_layers=n_layers)

    input_ids = jax.random.randint(ikey, (B, S), 0, vocab_size, dtype=jnp.int32)
    attention_mask = jnp.ones((B, S), jnp.float32).at[1, 11:].set(0.0)  # pad tail of ex. 1

    logits = distilbert_file_classifier_forward(params, input_ids, attention_mask)
    jax.block_until_ready(logits)
    assert logits.shape == (B, 1) and logits.dtype == jnp.float32
    assert bool(jnp.all(jnp.isfinite(logits)))
    print("KERNEL_OK")
</pallas_src>

<mosaic_0001>
module attributes {stable_mosaic.version = 11 : i64} {
  func.func @embed_ln_kernel(%arg0: i32, %arg1: memref<1x16x64xbf16, #tpu.memory_space<vmem>>, %arg2: memref<16x64xbf16, #tpu.memory_space<vmem>>, %arg3: memref<1x64xf32, #tpu.memory_space<vmem>>, %arg4: memref<1x64xf32, #tpu.memory_space<vmem>>, %arg5: memref<1x16x64xbf16, #tpu.memory_space<vmem>>) attributes {dimension_semantics = [#tpu.dimension_semantics<parallel>], iteration_bounds = array<i64: 2>, scalar_prefetch = 0 : i64, scratch_operands = 0 : i64, tpu.core_type = #tpu.core_type<tc>, window_params = [{transform_indices = @transform_0, window_bounds = array<i64: 1, 16, 64>}, {pipeline_mode = #tpu.pipeline_mode<synchronous>, transform_indices = @transform_1, window_bounds = array<i64: 16, 64>}, {pipeline_mode = #tpu.pipeline_mode<synchronous>, transform_indices = @transform_2, window_bounds = array<i64: 1, 64>}, {pipeline_mode = #tpu.pipeline_mode<synchronous>, transform_indices = @transform_3, window_bounds = array<i64: 1, 64>}, {transform_indices = @transform_4, window_bounds = array<i64: 1, 16, 64>}]} {
    %c0 = arith.constant 0 : index
    %c0_0 = arith.constant 0 : index
    %c0_1 = arith.constant 0 : index
    %0 = vector.load %arg1[%c0, %c0_0, %c0_1] : memref<1x16x64xbf16, #tpu.memory_space<vmem>>, vector<1x16x64xbf16>
    %1 = vector.shape_cast %0 : vector<1x16x64xbf16> to vector<16x64xbf16>
    %2 = arith.extf %1 : vector<16x64xbf16> to vector<16x64xf32>
    %c0_2 = arith.constant 0 : index
    %c0_3 = arith.constant 0 : index
    %3 = vector.load %arg2[%c0_2, %c0_3] : memref<16x64xbf16, #tpu.memory_space<vmem>>, vector<16x64xbf16>
    %4 = arith.extf %3 : vector<16x64xbf16> to vector<16x64xf32>
    %5 = arith.addf %2, %4 : vector<16x64xf32>
    %c0_4 = arith.constant 0 : index
    %c0_5 = arith.constant 0 : index
    %6 = vector.load %arg3[%c0_4, %c0_5] : memref<1x64xf32, #tpu.memory_space<vmem>>, vector<1x64xf32>
    %c0_6 = arith.constant 0 : index
    %c0_7 = arith.constant 0 : index
    %7 = vector.load %arg4[%c0_6, %c0_7] : memref<1x64xf32, #tpu.memory_space<vmem>>, vector<1x64xf32>
    %cst = arith.constant dense<0.000000e+00> : vector<16xf32>
    %8 = vector.multi_reduction <add>, %5, %cst [1] : vector<16x64xf32> to vector<16xf32>
    %9 = vector.shape_cast %8 : vector<16xf32> to vector<16x1xf32>
    %cst_8 = arith.constant 6.400000e+01 : f32
    %10 = vector.broadcast %cst_8 : f32 to vector<16x1xf32>
    %11 = arith.divf %9, %10 : vector<16x1xf32>
    %12 = vector.broadcast %11 : vector<16x1xf32> to vector<16x64xf32>
    %13 = arith.subf %5, %12 : vector<16x64xf32>
    %14 = arith.mulf %13, %13 : vector<16x64xf32>
    %cst_9 = arith.constant dense<0.000000e+00> : vector<16xf32>
    %15 = vector.multi_reduction <add>, %14, %cst_9 [1] : vector<16x64xf32> to vector<16xf32>
    %16 = vector.shape_cast %15 : vector<16xf32> to vector<16x1xf32>
    %cst_10 = arith.constant 6.400000e+01 : f32
    %17 = vector.broadcast %cst_10 : f32 to vector<16x1xf32>
    %18 = arith.divf %16, %17 : vector<16x1xf32>
    %19 = vector.broadcast %11 : vector<16x1xf32> to vector<16x64xf32>
    %20 = arith.subf %5, %19 : vector<16x64xf32>
    %cst_11 = arith.constant 9.99999996E-13 : f32
    %21 = vector.broadcast %cst_11 : f32 to vector<16x1xf32>
    %22 = arith.addf %18, %21 : vector<16x1xf32>
    %23 = math.rsqrt %22 : vector<16x1xf32>
    %24 = vector.broadcast %23 : vector<16x1xf32> to vector<16x64xf32>
    %25 = arith.mulf %20, %24 : vector<16x64xf32>
    %26 = vector.broadcast %6 : vector<1x64xf32> to vector<16x64xf32>
    %27 = arith.mulf %25, %26 : vector<16x64xf32>
    %28 = vector.broadcast %7 : vector<1x64xf32> to vector<16x64xf32>
    %29 = arith.addf %27, %28 : vector<16x64xf32>
    %30 = arith.truncf %29 : vector<16x64xf32> to vector<16x64xbf16>
    %c0_12 = arith.constant 0 : index
    %c0_13 = arith.constant 0 : index
    %c0_14 = arith.constant 0 : index
    %31 = vector.load %arg5[%c0_12, %c0_13, %c0_14] : memref<1x16x64xbf16, #tpu.memory_space<vmem>>, vector<1x16x64xbf16>
    %32 = vector.shape_cast %31 : vector<1x16x64xbf16> to vector<16x64xbf16>
    %33 = vector.shape_cast %30 : vector<16x64xbf16> to vector<1x16x64xbf16>
    tpu.vector_store %arg5[%c0_12, %c0_13, %c0_14], %33 {strides = array<i32>} : memref<1x16x64xbf16, #tpu.memory_space<vmem>>, vector<1x16x64xbf16>,
    return
  }
  func.func @transform_0(%arg0: i32) -> (i32, i32, i32) {
    %c0_i32 = arith.constant 0 : i32
    %c0_i32_0 = arith.constant 0 : i32
    %c0_i32_1 = arith.constant 0 : i32
    return %arg0, %c0_i32, %c0_i32_0 : i32, i32, i32
  }
  func.func @transform_1(%arg0: i32) -> (i32, i32) {
    %c0_i32 = arith.constant 0 : i32
    %c0_i32_0 = arith.constant 0 : i32
    %c0_i32_1 = arith.constant 0 : i32
    return %c0_i32, %c0_i32_0 : i32, i32
  }
  func.func @transform_2(%arg0: i32) -> (i32, i32) {
    %c0_i32 = arith.constant 0 : i32
    %c0_i32_0 = arith.constant 0 : i32
    %c0_i32_1 = arith.constant 0 : i32
    return %c0_i32, %c0_i32_0 : i32, i32
  }
  func.func @transform_3(%arg0: i32) -> (i32, i32) {
    %c0_i32 = arith.constant 0 : i32
    %c0_i32_0 = arith.constant 0 : i32
    %c0_i32_1 = arith.constant 0 : i32
    return %c0_i32, %c0_i32_0 : i32, i32
  }
  func.func @transform_4(%arg0: i32) -> (i32, i32, i32) {
    %c0_i32 = arith.constant 0 : i32
    %c0_i32_0 = arith.constant 0 : i32
    %c0_i32_1 = arith.constant 0 : i32
    return %arg0, %c0_i32, %c0_i32_0 : i32, i32, i32
  }
}

</mosaic_0001>

<bundles_post_ra>
// kernel: tpu_custom_call.1
= control target key start
LH: loop header
LB: loop body
LE: loop exit
PB: predicated region body
PF: predicated region fallthrough
CT: control target
= control target key end

     0   :  { %9 = vsyncpa [#allocation3], 0  ;;  %s845_s0 = inlined_call_operand.hbm [shape: bf16[2,16,64], index: 0, kind: input, shape index: {}]   ;;  %s846_s1 = inlined_call_operand.hbm [shape: bf16[16,64], index: 1, kind: input, shape index: {}]   ;;  %s847_s2 = inlined_call_operand.vmem [shape: f32[1,64], index: 2, kind: input, shape index: {}]   ;;  %s848_s3 = inlined_call_operand.vmem [shape: f32[1,64], index: 3, kind: input, shape index: {}]   ;;  %s849_s4 = inlined_call_operand.hbm [shape: bf16[2,16,64], index: 4, kind: output, shape index: {}]  }
   0x1   :  { %11 = vsyncpa [#allocation3 + $0x1], 0 }
   0x2   :  { %12 = vsyncpa [#allocation6], 0 }
   0x3   :  { %13 = vsyncpa [#allocation4], 0 }
   0x4   :  { %15 = vsyncpa [#allocation4 + $0x1], 0  ;;  %s648_s15 = smov 0   ;;  %s650_s16 = smov 0  }
   0x5   :  { %s652_s17 = smov 0   ;;  %s654_s18 = smov 0  }
   0x6 LB: > { %s669_s19 = sadd.s32 4294967295, %s614_s18   ;;  %s395_s20 = sadd.s32 4294967294, %s614_s18   ;;  %s614_s18 = sphi %s654_s18, %s871_s18   ;;  %s610_s17 = sphi %s652_s17, %s870_s17   ;;  %s606_s16 = sphi %s650_s16, %s869_s16   ;;  %s602_s15 = sphi %s648_s15, %s868_s15  }
   0x7   : > { %p41_p0 = scmp.ne.s32.totalorder %s606_s16, %s602_s15  ;;  %p850_p1 = scmp.eq.s32.totalorder %s669_s19, 0 }
   0x8   : > { %p134_p3 = scmp.eq.s32.totalorder %s395_s20, 1  ;;  %p396_p5 = scmp.ge.s32.totalorder %s614_s18, 1 }
   0x9   : > { %p678_p4 = por %p850_p1, %p41_p0  ;;  %p141_p7 = scmp.lt.s32.totalorder %s614_s18, 3 }
   0xa   : > { %p683_p6 = por %p134_p3, %p41_p0  ;;  %s616_s24 = smov [#allocation5]  }
   0xb   : > { %s854_s21 = scalar_select %p678_p4, 1, 0 }
   0xc   : > { %s855_s22 = scalar_select %p683_p6, 1, 0 }
   0xd   : > { %p688_p8 = pnand %p396_p5, %p141_p7  ;;  %s153_s25 = sshll.u32 %s616_s24, 4  ;;  %s154_s25 = int_to_ptr.vmem [resolvable:$true] %s153_s25 }
   0xe   : > { %s702_s27 = sadd.s32 1, %s614_s18   ;;  %s28_s28 = sadd.s32 1, %s610_s17 }
   0xf   : > { %s856_s23 = scalar_select %p688_p8, 1, 0 }
  0x10   : > { %p435_p9 = pneg %p688_p8  ;;  %s25_s29 = ssub.s32 %s614_s18, %s702_s27 }
  0x11   : > { %s503_s30 = scalar_lea.vmem %s154_s25, 128  ;;  %p511_p5 = scmp.lt.s32.totalorder %s154_s25, %s154_s25 }
  0x12   : > { %p697_p11 = pnand %p435_p9, %p850_p1  ;;  %p504_p13 = scmp.ne.s32.totalorder %s154_s25, %s503_s30 }
  0x13   : > { %p512_p7 = scmp.lt.s32.totalorder %s503_s30, %s503_s30 }
  0x14   : > { %p494_p12 = pneg %p697_p11 }
  0x15   : > { %p513_p10 = por %p512_p7, %p511_p5 }
  0x16   : > { %p506_p0 = pnand %p504_p13, %p494_p12 }
  0x18   : > { %p507_p3 = pneg %p506_p0 }
  0x1a   : > { %p514_p2 = pnand %p513_p10, %p507_p3 }
  0x1c   : > { %517 = shalt.err (!%p514_p2)
}
  0x1d   : > { %s617_s5 = smov 64   ;;  %s618_s6 = smov 4  }
  0x1e   : > { %438 = dma.hbm_to_vmem [thread:$0]  (!%p697_p11), %s846_s1, 128, %s154_s25, [#allocation6], %s617_s5, %s617_s5, %s618_s6  }
  0x1f   : > { %p26_p2 = scmp.eq.s32.totalorder %s25_s29, 0  ;;  %p35_p9 = scmp.ne.s32.totalorder %s610_s17, %s606_s16 }
  0x20   : > { %p36_p10 = scmp.eq.s32.totalorder %s614_s18, 0  ;;  %p448_p12 = scmp.lt.s32.totalorder %s614_s18, 2 }
  0x21   : > { %s722_s9 = scalar_select %p26_p2, %s610_s17, %s28_s28  }
  0x22   : > { %p37_p13 = por %p36_p10, %p35_p9  ;;  %p858_p0 = scmp.eq.s32.totalorder %s669_s19, 1 }
  0x23   : > { %s173_s11 = sand.u32 1, %s610_s17   ;;  %s415_s12 = sshll.u32 %s614_s18, 7 }
  0x24   : > { %p726_p3 = por %p858_p0, %p35_p9  ;;  %s399_s13 = sshll.u32 %s173_s11, 3 }
  0x25   : > { %s735_s24 = scalar_lea.hbm %s845_s0, %s415_s12  ;;  %s177_s25 = scalar_lea.vmem [#allocation2], %s399_s13 }
  0x26   : > { %s859_s10 = scalar_select %p726_p3, 1, 0 }
  0x27   : > { %s184_s26 = sshll.u32 %s177_s25, 4  ;;  %p737_p11 = pnand %p448_p12, %p37_p13  ;;  %s741_s26 = int_to_ptr.vmem [resolvable:$true] %s184_s26 }
  0x28   : > { %s743_s29 = scalar_lea.sflag [#allocation3], %s173_s11  ;;  %s518_s30 = scalar_lea.hbm %s735_s24, 128 }
  0x29   : > { %p519_p5 = scmp.ne.s32.totalorder %s735_s24, %s518_s30  ;;  %p520_p7 = pneg %p737_p11 }
  0x2a   : > { %s523_s12 = scalar_lea.hbm %s845_s0, 256  ;;  %p524_p10 = scmp.lt.s32.totalorder %s735_s24, %s845_s0 }
  0x2b   : > { %p521_p2 = pnand %p520_p7, %p519_p5  ;;  %p525_p12 = scmp.lt.s32.totalorder %s523_s12, %s518_s30 }
  0x2d   : > { %p522_p9 = pneg %p521_p2  ;;  %p526_p13 = por %p525_p12, %p524_p10 }
  0x2f   : > { %p527_p0 = pnand %p526_p13, %p522_p9 }
  0x31   : > { %530 = shalt.err (!%p527_p0)
}
  0x32   : > { %s531_s11 = scalar_lea.vmem %s741_s26, 128  ;;  %s619_s20 = smov [#allocation2]  }
  0x33   : > { %p532_p1 = scmp.ne.s32.totalorder %s741_s26, %s531_s11  ;;  %s536_s25 = sshll.u32 %s619_s20, 4  ;;  %s537_s25 = int_to_ptr.vmem [resolvable:$false] %s536_s25 }
  0x34   : > { %s538_s7 = scalar_lea.vmem %s537_s25, 256  ;;  %p539_p2 = scmp.lt.s32.totalorder %s741_s26, %s537_s25 }
  0x35   : > { %p534_p6 = pnand %p532_p1, %p520_p7  ;;  %p540_p3 = scmp.lt.s32.totalorder %s538_s7, %s531_s11 }
  0x37   : > { %p535_p5 = pneg %p534_p6  ;;  %p541_p4 = por %p540_p3, %p539_p2 }
  0x39   : > { %p542_p8 = pnand %p541_p4, %p535_p5 }
  0x3b   : > { %545 = shalt.err (!%p542_p8)
}
  0x3c   : > { %442 = dma.hbm_to_vmem [thread:$0]  (!%p737_p11), %s735_s24, 128, %s741_s26, %s743_s29, %s617_s5, %s617_s5, %s618_s6  }
  0x3d   : > { %p861_p1 = scmp.ne.s32.totalorder %s856_s23, 0 }
  0x3e   : > { %s770_s30 = sand.u32 (!%p861_p1), 1, %s606_s16   ;;  %p862_p4 = scmp.ne.s32.totalorder (!%p861_p1), %s854_s21, 0 }
  0x3f   : > { %196 = sbr.rel (%p861_p1) target bundleno = 405 (0x195), region = 36  ;;  %s403_s8 = sshll.u32 (!%p861_p1), %s770_s30, 3 }
  0x40   : > { %s199_s12 = scalar_lea.sflag (!%p861_p1), [#allocation3], %s770_s30  ;;  %s202_s28 = scalar_lea.vmem (!%p861_p1), [#allocation2], %s403_s8 }
  0x44   : > { %589 = dma.done.wait (%p862_p4), %s199_s12, 128  }
  0x45   : > { %591 = vsyncadd (%p862_p4), %s199_s12, 4294967168  ;;  %p863_p6 = scmp.eq.s32.totalorder %s669_s19, 0 }
  0x47   : > { %593 = dma.done.wait (%p863_p6), [#allocation6], 128   ;;  %p864_p8 = pmov %p863_p6 }
  0x48   : > { %v420_v0 = vld [vmem:[%s202_s28] sm:$0xff]   ;;  %v424_v1 = vld [vmem:[#allocation5] sm:$0xff]   ;;  %vm243_vm0 = vcmask 523264   ;;  %vm295_vm1 = vcmask 519168   ;;  %s418_s24 = sshll.u32 %s669_s19, 7  ;;  %s230_s26 = scalar_lea.vmem [#allocation7], %s403_s8 }
  0x49   : > { %595 = vsyncadd (%p864_p8), [#allocation6], 4294967168  ;;  %v421_v2 = vunpack.c.l.bf16 %v420_v0  ;;  %v425_v3 = vunpack.c.l.bf16 %v424_v1  ;;  %v422_v4 = vunpack.c.h.bf16 %v420_v0  ;;  %v426_v5 = vunpack.c.h.bf16 %v424_v1  ;;  %v406_v27 = vld [vmem:[%s847_s2] ss:$0 sm:$0xff]  ;;  %s312_s29 = sshll.u32 %s230_s26, 4  ;;  %s800_s11 = scalar_lea.hbm %s849_s4, %s418_s24  ;;  %s802_s29 = int_to_ptr.vmem [resolvable:$true] %s312_s29 }
  0x4a   : > { %v407_v29 = vld [vmem:[%s848_s3] ss:$0 sm:$0xff]  ;;  %s299_s20 = scalar_lea.sflag [#allocation4], %s770_s30  ;;  %s546_s25 = scalar_lea.vmem %s802_s29, 128 }
  0x4b   : > { %v239_v6 = vadd.f32 %v425_v3, %v421_v2  ;;  %v240_v7 = vadd.f32 %v426_v5, %v422_v4  ;;  %p547_p3 = scmp.ne.s32.totalorder %s802_s29, %s546_s25  ;;  %p865_p11 = scmp.ne.s32.totalorder %s859_s10, 0 }
  0x4c   : > { %s620_s19 = smov [#allocation7]  }
  0x4d   : > { %v244_v8 = vsel %vm243_vm0, %v239_v6, 0.0  ;;  %v247_v9 = vsel %vm243_vm0, %v240_v7, 0.0  ;;  %p548_p7 = pnand %p547_p3, %p865_p11  ;;  %s550_s7 = sshll.u32 %s620_s19, 4  ;;  %s551_s7 = int_to_ptr.vmem [resolvable:$false] %s550_s7 }
  0x4e   : > { %245 = vadd.xlane.f32.xlu0 %v244_v8  ;;  %s552_s8 = scalar_lea.vmem %s551_s7, 256  ;;  %p553_p10 = scmp.lt.s32.totalorder %s802_s29, %s551_s7 }
  0x4f   : > { %p549_p9 = pneg %p548_p7  ;;  %p554_p12 = scmp.lt.s32.totalorder %s552_s8, %s546_s25 }
  0x51   : > { %p555_p13 = por %p554_p12, %p553_p10 }
  0x52   : > { %248 = vadd.xlane.f32.xlu0 %v247_v9 }
  0x53   : > { %p556_p0 = pnand %p555_p13, %p549_p9 }
  0xd7   : > { %v246_v10 = vpop.xlane.xlu0 %245 }
  0xd8   : > { %v251_v11 = vmul.f32 0.015625, %v246_v10 }
  0xda   : > { %v253_v12 = vsub.f32 %v239_v6, %v251_v11 }
  0xdb   : > { %v249_v13 = vpop.xlane.xlu0 %248 }
  0xdc   : > { %v252_v14 = vmul.f32 0.015625, %v249_v13  ;;  %v255_v15 = vmul.f32 %v253_v12, %v253_v12 }
  0xde   : > { %v254_v16 = vsub.f32 %v240_v7, %v252_v14  ;;  %v257_v17 = vsel %vm243_vm0, %v255_v15, 0.0 }
  0xdf   : > { %258 = vadd.xlane.f32.xlu1 %v257_v17 }
  0xe0   : > { %v256_v18 = vmul.f32 %v254_v16, %v254_v16 }
  0xe2   : > { %v260_v19 = vsel %vm243_vm0, %v256_v18, 0.0 }
  0xe3   : > { %261 = vadd.xlane.f32.xlu1 %v260_v19 }
 0x168   : > { %v259_v20 = vpop.xlane.xlu1 %258 }
 0x169   : > { %v263_v21 = vmul.f32 0.015625, %v259_v20 }
 0x16b   : > { %v265_v22 = vadd.f32 1e-12, %v263_v21 }
 0x16c   : > { %v262_v23 = vpop.xlane.xlu1 %261 }
 0x16d   : > { %488 = vrsqrt.f32 %v265_v22  ;;  %v264_v24 = vmul.f32 0.015625, %v262_v23 }
 0x16f   : > { %v266_v25 = vadd.f32 1e-12, %v264_v24 }
 0x171   : > { %490 = vrsqrt.f32 %v266_v25 }
 0x17a   : > { %v489_v26 = vpop.eup %488 }
 0x17b   : > { %v269_v28 = vmul.f32 %v489_v26, %v253_v12 }
 0x17d   : > { %v277_v30 = vmul.f32 %v406_v27, %v269_v28 }
 0x17e   : > { %v491_v31 = vpop.eup %490 }
 0x17f   : > { %v285_v32 = vadd.f32 %v407_v29, %v277_v30  ;;  %v270_v33 = vmul.f32 %v491_v31, %v254_v16 }
 0x181   : > { %v416_v34 = vpack.c.bf16 %v285_v32, %v285_v32  ;;  %v278_v35 = vmul.f32 %v406_v27, %v270_v33 }
 0x183   : > { %v286_v36 = vadd.f32 %v407_v29, %v278_v35  ;;  %296 = vst.msk [vmem:[%s230_s26] sm:$0xf] %vm295_vm1, %v416_v34 }
 0x185   : > { %v417_v37 = vpack.c.bf16 %v286_v36, %v286_v36 }
 0x187   : > { %297 = vst.msk [vmem:[%s230_s26 + $0x4] sm:$0xf] %vm295_vm1, %v417_v37 }
 0x188   : > { %559 = shalt.err (!%p556_p0)
}
 0x189   : > { %s560_s12 = scalar_lea.hbm %s800_s11, 128  ;;  %s564_s23 = scalar_lea.hbm %s849_s4, 256 }
 0x18a   : > { %p561_p5 = scmp.ne.s32.totalorder %s800_s11, %s560_s12  ;;  %p565_p4 = scmp.lt.s32.totalorder %s800_s11, %s849_s4 }
 0x18b   : > { %p566_p6 = scmp.lt.s32.totalorder %s564_s23, %s560_s12 }
 0x18c   : > { %p562_p2 = pnand %p561_p5, %p865_p11 }
 0x18d   : > { %p567_p8 = por %p566_p6, %p565_p4 }
 0x18e   : > { %p563_p1 = pneg %p562_p2 }
 0x190   : > { %p568_p3 = pnand %p567_p8, %p563_p1 }
 0x192   : > { %571 = shalt.err (!%p568_p3)
}
 0x193   : > { %s621_s24 = smov 64   ;;  %s622_s26 = smov 4  }
 0x194   : > { %433 = dma.vmem_to_hbm [thread:$0]  (%p865_p11), %s802_s29, 128, %s800_s11, %s299_s20, %s621_s24, %s621_s24, %s622_s26  }
 0x195 PF: > { %s327_s13 = sand.u32 1, %s602_s15   ;;  %p866_p7 = scmp.ne.s32.totalorder %s855_s22, 0 }
 0x196   : > { %p867_p9 = scmp.ge.s32.totalorder %s614_s18, 2  ;;  %s328_s14 = scalar_lea.sflag [#allocation4], %s327_s13 }
 0x198   : > { %p444_p10 = pnand %p867_p9, %p866_p7 }
 0x19a   : > { %p445_p12 = pneg %p444_p10 }
 0x19c   : > { %597 = dma.done.wait (%p445_p12), %s328_s14, 128  }
 0x19d   : > { %599 = vsyncadd (%p445_p12), %s328_s14, 4294967168  ;;  %p18_p13 = scmp.ge.s32.totalorder %s702_s27, 4   ;;  %s868_s15 = smov %s606_s16 }
 0x19e   : > { %s869_s16 = smov %s610_s17  ;;  %s870_s17 = smov %s722_s9 }
 0x19f   : > { %s871_s18 = smov %s702_s27  ;;  %20 = sbr.rel (!%p18_p13) target bundleno = 6 (0x6), region = 85 }
 0x1a4   :  { %333 = vsyncpa [#allocation3], 1 }
 0x1a5   :  { %335 = vsyncpa [#allocation3 + $0x1], 1 }
 0x1a6   :  { %336 = vsyncpa [#allocation6], 1 }
 0x1a7   :  { %337 = vsyncpa [#allocation4], 1 }
 0x1a8   :  { %339 = vsyncpa [#allocation4 + $0x1], 1 }

</bundles_post_ra>
